<compile_context>
chip_gen: v7x
topology: tpu7x:2x2x1
jax: 0.10.0
libtpu: 0.0.40
codegen_flags: <defaults>
</compile_context>

<pallas_src>
import jax
import jax.numpy as jnp
from jax.experimental import pallas as pl
from jax.experimental.pallas import tpu as pltpu


def _gelu_exact(v):
    # nn.GELU() default (approximate='none'): 0.5*x*(1+erf(x/sqrt(2)))
    inv_sqrt2 = jnp.asarray(0.7071067811865476, dtype=v.dtype)
    return 0.5 * v * (1.0 + jax.lax.erf(v * inv_sqrt2))


def classifier_kernel(x_ref, w1_ref, b1_ref, w2_ref, b2_ref, w3_ref, b3_ref, o_ref):
    # x_ref : (TB, S, D)   TB whole batches per grid step
    # w1_ref: (H, D)       fc1 weight, native PyTorch layout (contract D with D)
    # b1_ref: (1, H)
    # w2_ref: (1, H)       fc2 weight (native (1, hidden))
    # b2_ref: (1, 1)
    # w3_ref: (1, S)       fc3 weight (native (1, seq_len))
    # b3_ref: (1, 1)
    # o_ref : (TB, 1)
    TB, S, D = x_ref.shape

    x2 = x_ref[...].reshape(TB * S, D)
    # fc1 on the MXU; transposed RHS handled natively by dot_general.
    h = jax.lax.dot_general(
        x2, w1_ref[...],
        dimension_numbers=(((1,), (1,)), ((), ())),
        preferred_element_type=jnp.float32,
    ) + b1_ref[...]                                           # (TB*S, H)
    g = _gelu_exact(h).reshape(TB, S, w1_ref.shape[0])        # (TB, S, H)

    # fc2 (H -> 1): VPU multiply + lane reduction (no N=1 MXU matmul).
    s = jnp.sum(g * w2_ref[...], axis=-1) + b2_ref[...]       # (TB, S)
    sg = _gelu_exact(s)                                       # (TB, S)

    # fc3 (seq -> 1): per-batch weighted seq reduction, VPU multiply + XLU reduce.
    y = jnp.sum(sg * w3_ref[...], axis=-1, keepdims=True) + b3_ref[...]  # (TB, 1)
    o_ref[...] = jax.nn.sigmoid(y)


def _pick_block_batches(B, S, target_rows=1024):
    """Largest batch-tile TB dividing B with ~target_rows rows per step.

    Prefer TB == B (single block == full output dim) or TB % 8 == 0 so the
    (TB, 1) output block satisfies the sublane tiling rule when TB < B.
    """
    target = max(1, target_rows // max(S, 1))
    if B <= target:
        return B
    for tb in range(min(target, B), 0, -1):
        if B % tb == 0 and (tb % 8 == 0 or tb == B):
            return tb
    return B


def classifier_forward(x, params):
    """x: (batch, seq_len, dim) float32. Returns (batch, 1) float32."""
    B, S, D = x.shape
    w1, b1, w2, b2, w3, b3 = (params[k] for k in ("w1", "b1", "w2", "b2", "w3", "b3"))
    H = w1.shape[0]

    x = x.astype(jnp.float32)
    b1r = b1.reshape(1, H)
    w2r = w2.reshape(1, H)        # native (1, hidden)
    b2r = b2.reshape(1, 1)
    w3r = w3.reshape(1, S)        # native (1, seq_len)
    b3r = b3.reshape(1, 1)

    TB = _pick_block_batches(B, S)
    grid = (B // TB,)

    # VMEM sizing: double-buffered x block + weights + f32 intermediates, with headroom.
    est_bytes = 4 * (2 * TB * S * D + 2 * H * D + 4 * TB * S * H + 8 * (2 * H + S + TB + 4))
    vmem_limit = int(min(64 * 1024 * 1024, max(16 * 1024 * 1024, 2 * est_bytes)))

    cost = pl.CostEstimate(
        flops=2 * B * S * D * H + 2 * B * S * H + 2 * B * S,
        transcendentals=B * S * H + B * S + B,
        bytes_accessed=4 * (B * S * D + H * D + 2 * H + S + B + 3),
    )

    out = pl.pallas_call(
        classifier_kernel,
        out_shape=jax.ShapeDtypeStruct((B, 1), jnp.float32),
        grid=grid,
        in_specs=[
            pl.BlockSpec((TB, S, D), lambda i: (i, 0, 0)),
            pl.BlockSpec((H, D), lambda i: (0, 0)),
            pl.BlockSpec((1, H), lambda i: (0, 0)),
            pl.BlockSpec((1, H), lambda i: (0, 0)),
            pl.BlockSpec((1, 1), lambda i: (0, 0)),
            pl.BlockSpec((1, S), lambda i: (0, 0)),
            pl.BlockSpec((1, 1), lambda i: (0, 0)),
        ],
        out_specs=pl.BlockSpec((TB, 1), lambda i: (i, 0)),
        compiler_params=pltpu.CompilerParams(
            dimension_semantics=("parallel",),
            vmem_limit_bytes=vmem_limit,
        ),
        cost_estimate=cost,
    )(x, w1, b1r, w2r, b2r, w3r, b3r)
    return out


def classifier_ref(x, params):
    # Pure-JAX reference mirroring the PyTorch forward exactly.
    w1, b1, w2, b2, w3, b3 = (params[k] for k in ("w1", "b1", "w2", "b2", "w3", "b3"))
    h = jax.nn.gelu(jnp.einsum("bsd,hd->bsh", x, w1) + b1, approximate=False)
    s = jnp.squeeze(jnp.einsum("bsh,oh->bso", h, w2) + b2, -1)      # (B, S)
    s = jax.nn.gelu(s, approximate=False)
    y = jnp.einsum("bs,os->bo", s, w3) + b3                          # (B, 1)
    return jax.nn.sigmoid(y)


def init_params(key, dim, seq_len, hidden_dim):
    ks = jax.random.split(key, 6)
    scale = 0.1
    return {
        "w1": scale * jax.random.normal(ks[0], (hidden_dim, dim), jnp.float32),
        "b1": scale * jax.random.normal(ks[1], (hidden_dim,), jnp.float32),
        "w2": scale * jax.random.normal(ks[2], (1, hidden_dim), jnp.float32),
        "b2": scale * jax.random.normal(ks[3], (1,), jnp.float32),
        "w3": scale * jax.random.normal(ks[4], (1, seq_len), jnp.float32),
        "b3": scale * jax.random.normal(ks[5], (1,), jnp.float32),
    }


if __name__ == "__main__":
    batch, seq_len, dim, hidden_dim = 2, 8, 32, 32
    key = jax.random.PRNGKey(0)
    kx, kp = jax.random.split(key)
    x = jax.random.normal(kx, (batch, seq_len, dim), jnp.float32)
    params = init_params(kp, dim, seq_len, hidden_dim)

    out = classifier_forward(x, params)
    out = jax.block_until_ready(out)

    ref = classifier_ref(x, params)
    assert out.shape == (batch, 1)
    assert jnp.allclose(out, ref, atol=1e-5, rtol=1e-5), (out, ref)
    print("KERNEL_OK")
</pallas_src>

<mosaic_0001>
module attributes {stable_mosaic.version = 11 : i64} {
  func.func @classifier_kernel(%arg0: i32, %arg1: memref<2x8x32xf32, #tpu.memory_space<vmem>>, %arg2: memref<32x32xf32, #tpu.memory_space<vmem>>, %arg3: memref<1x32xf32, #tpu.memory_space<vmem>>, %arg4: memref<1x32xf32, #tpu.memory_space<vmem>>, %arg5: memref<1x1xf32, #tpu.memory_space<vmem>>, %arg6: memref<1x8xf32, #tpu.memory_space<vmem>>, %arg7: memref<1x1xf32, #tpu.memory_space<vmem>>, %arg8: memref<2x1xf32, #tpu.memory_space<vmem>>) attributes {dimension_semantics = [#tpu.dimension_semantics<parallel>], iteration_bounds = array<i64: 1>, scalar_prefetch = 0 : i64, scratch_operands = 0 : i64, tpu.core_type = #tpu.core_type<tc>, window_params = [{transform_indices = @transform_0, window_bounds = array<i64: 2, 8, 32>}, {pipeline_mode = #tpu.pipeline_mode<synchronous>, transform_indices = @transform_1, window_bounds = array<i64: 32, 32>}, {pipeline_mode = #tpu.pipeline_mode<synchronous>, transform_indices = @transform_2, window_bounds = array<i64: 1, 32>}, {pipeline_mode = #tpu.pipeline_mode<synchronous>, transform_indices = @transform_3, window_bounds = array<i64: 1, 32>}, {pipeline_mode = #tpu.pipeline_mode<synchronous>, transform_indices = @transform_4, window_bounds = array<i64: 1, 1>}, {pipeline_mode = #tpu.pipeline_mode<synchronous>, transform_indices = @transform_5, window_bounds = array<i64: 1, 8>}, {pipeline_mode = #tpu.pipeline_mode<synchronous>, transform_indices = @transform_6, window_bounds = array<i64: 1, 1>}, {transform_indices = @transform_7, window_bounds = array<i64: 2, 1>}]} {
    %c0 = arith.constant 0 : index
    %c0_0 = arith.constant 0 : index
    %c0_1 = arith.constant 0 : index
    %0 = vector.load %arg1[%c0, %c0_0, %c0_1] : memref<2x8x32xf32, #tpu.memory_space<vmem>>, vector<2x8x32xf32>
    %1 = vector.shape_cast %0 : vector<2x8x32xf32> to vector<16x32xf32>
    %c0_2 = arith.constant 0 : index
    %c0_3 = arith.constant 0 : index
    %2 = vector.load %arg2[%c0_2, %c0_3] : memref<32x32xf32, #tpu.memory_space<vmem>>, vector<32x32xf32>
    %cst = arith.constant dense<0.000000e+00> : vector<16x32xf32>
    %3 = tpu.matmul %1, %2, %cst {dimension_numbers = #tpu.dot_dimension_numbers<[1], [1], [0], [0], [0, 0, 1, 0], [], []>} : vector<16x32xf32>, vector<32x32xf32>, vector<16x32xf32> -> vector<16x32xf32>
    %c0_4 = arith.constant 0 : index
    %c0_5 = arith.constant 0 : index
    %4 = vector.load %arg3[%c0_4, %c0_5] : memref<1x32xf32, #tpu.memory_space<vmem>>, vector<1x32xf32>
    %5 = vector.broadcast %4 : vector<1x32xf32> to vector<16x32xf32>
    %6 = arith.addf %3, %5 : vector<16x32xf32>
    %cst_6 = arith.constant 5.000000e-01 : f32
    %7 = vector.broadcast %cst_6 : f32 to vector<16x32xf32>
    %8 = arith.mulf %7, %6 : vector<16x32xf32>
    %cst_7 = arith.constant 0.707106769 : f32
    %9 = vector.broadcast %cst_7 : f32 to vector<16x32xf32>
    %10 = arith.mulf %6, %9 : vector<16x32xf32>
    %11 = math.erf %10 : vector<16x32xf32>
    %cst_8 = arith.constant 1.000000e+00 : f32
    %12 = vector.broadcast %cst_8 : f32 to vector<16x32xf32>
    %13 = arith.addf %12, %11 : vector<16x32xf32>
    %14 = arith.mulf %8, %13 : vector<16x32xf32>
    %15 = vector.shape_cast %14 : vector<16x32xf32> to vector<2x8x32xf32>
    %c0_9 = arith.constant 0 : index
    %c0_10 = arith.constant 0 : index
    %16 = vector.load %arg4[%c0_9, %c0_10] : memref<1x32xf32, #tpu.memory_space<vmem>>, vector<1x32xf32>
    %17 = vector.shape_cast %16 : vector<1x32xf32> to vector<1x1x32xf32>
    %18 = vector.broadcast %17 : vector<1x1x32xf32> to vector<2x8x32xf32>
    %19 = arith.mulf %15, %18 : vector<2x8x32xf32>
    %cst_11 = arith.constant dense<0.000000e+00> : vector<2x8xf32>
    %20 = vector.multi_reduction <add>, %19, %cst_11 [2] : vector<2x8x32xf32> to vector<2x8xf32>
    %c0_12 = arith.constant 0 : index
    %c0_13 = arith.constant 0 : index
    %21 = vector.load %arg5[%c0_12, %c0_13] : memref<1x1xf32, #tpu.memory_space<vmem>>, vector<1x1xf32>
    %22 = vector.broadcast %21 : vector<1x1xf32> to vector<2x8xf32>
    %23 = arith.addf %20, %22 : vector<2x8xf32>
    %cst_14 = arith.constant 5.000000e-01 : f32
    %24 = vector.broadcast %cst_14 : f32 to vector<2x8xf32>
    %25 = arith.mulf %24, %23 : vector<2x8xf32>
    %cst_15 = arith.constant 0.707106769 : f32
    %26 = vector.broadcast %cst_15 : f32 to vector<2x8xf32>
    %27 = arith.mulf %23, %26 : vector<2x8xf32>
    %28 = math.erf %27 : vector<2x8xf32>
    %cst_16 = arith.constant 1.000000e+00 : f32
    %29 = vector.broadcast %cst_16 : f32 to vector<2x8xf32>
    %30 = arith.addf %29, %28 : vector<2x8xf32>
    %31 = arith.mulf %25, %30 : vector<2x8xf32>
    %c0_17 = arith.constant 0 : index
    %c0_18 = arith.constant 0 : index
    %32 = vector.load %arg6[%c0_17, %c0_18] : memref<1x8xf32, #tpu.memory_space<vmem>>, vector<1x8xf32>
    %33 = vector.broadcast %32 : vector<1x8xf32> to vector<2x8xf32>
    %34 = arith.mulf %31, %33 : vector<2x8xf32>
    %cst_19 = arith.constant dense<0.000000e+00> : vector<2xf32>
    %35 = vector.multi_reduction <add>, %34, %cst_19 [1] : vector<2x8xf32> to vector<2xf32>
    %36 = vector.shape_cast %35 : vector<2xf32> to vector<2x1xf32>
    %c0_20 = arith.constant 0 : index
    %c0_21 = arith.constant 0 : index
    %37 = vector.load %arg7[%c0_20, %c0_21] : memref<1x1xf32, #tpu.memory_space<vmem>>, vector<1x1xf32>
    %38 = vector.broadcast %37 : vector<1x1xf32> to vector<2x1xf32>
    %39 = arith.addf %36, %38 : vector<2x1xf32>
    %40 = arith.negf %39 : vector<2x1xf32>
    %41 = math.exp %40 : vector<2x1xf32>
    %cst_22 = arith.constant 1.000000e+00 : f32
    %42 = vector.broadcast %cst_22 : f32 to vector<2x1xf32>
    %43 = arith.addf %42, %41 : vector<2x1xf32>
    %44 = arith.divf %42, %43 : vector<2x1xf32>
    %c0_23 = arith.constant 0 : index
    %c0_24 = arith.constant 0 : index
    %45 = vector.load %arg8[%c0_23, %c0_24] : memref<2x1xf32, #tpu.memory_space<vmem>>, vector<2x1xf32>
    tpu.vector_store %arg8[%c0_23, %c0_24], %44 {strides = array<i32>} : memref<2x1xf32, #tpu.memory_space<vmem>>, vector<2x1xf32>,
    return
  }
  func.func @transform_0(%arg0: i32) -> (i32, i32, i32) {
    %c0_i32 = arith.constant 0 : i32
    %c0_i32_0 = arith.constant 0 : i32
    %c0_i32_1 = arith.constant 0 : i32
    return %arg0, %c0_i32, %c0_i32_0 : i32, i32, i32
  }
  func.func @transform_1(%arg0: i32) -> (i32, i32) {
    %c0_i32 = arith.constant 0 : i32
    %c0_i32_0 = arith.constant 0 : i32
    %c0_i32_1 = arith.constant 0 : i32
    return %c0_i32, %c0_i32_0 : i32, i32
  }
  func.func @transform_2(%arg0: i32) -> (i32, i32) {
    %c0_i32 = arith.constant 0 : i32
    %c0_i32_0 = arith.constant 0 : i32
    %c0_i32_1 = arith.constant 0 : i32
    return %c0_i32, %c0_i32_0 : i32, i32
  }
  func.func @transform_3(%arg0: i32) -> (i32, i32) {
    %c0_i32 = arith.constant 0 : i32
    %c0_i32_0 = arith.constant 0 : i32
    %c0_i32_1 = arith.constant 0 : i32
    return %c0_i32, %c0_i32_0 : i32, i32
  }
  func.func @transform_4(%arg0: i32) -> (i32, i32) {
    %c0_i32 = arith.constant 0 : i32
    %c0_i32_0 = arith.constant 0 : i32
    %c0_i32_1 = arith.constant 0 : i32
    return %c0_i32, %c0_i32_0 : i32, i32
  }
  func.func @transform_5(%arg0: i32) -> (i32, i32) {
    %c0_i32 = arith.constant 0 : i32
    %c0_i32_0 = arith.constant 0 : i32
    %c0_i32_1 = arith.constant 0 : i32
    return %c0_i32, %c0_i32_0 : i32, i32
  }
  func.func @transform_6(%arg0: i32) -> (i32, i32) {
    %c0_i32 = arith.constant 0 : i32
    %c0_i32_0 = arith.constant 0 : i32
    %c0_i32_1 = arith.constant 0 : i32
    return %c0_i32, %c0_i32_0 : i32, i32
  }
  func.func @transform_7(%arg0: i32) -> (i32, i32) {
    %c0_i32 = arith.constant 0 : i32
    %c0_i32_0 = arith.constant 0 : i32
    return %arg0, %c0_i32 : i32, i32
  }
}

</mosaic_0001>

<bundles_post_ra>
// kernel: tpu_custom_call.1
= control target key start
LH: loop header
LB: loop body
LE: loop exit
PB: predicated region body
PF: predicated region fallthrough
CT: control target
= control target key end

     0   :  { %s472_s0 = inlined_call_operand.hbm [shape: f32[2,8,32], index: 0, kind: input, shape index: {}]   ;;  %s473_s1 = inlined_call_operand.hbm [shape: f32[32,32], index: 1, kind: input, shape index: {}]   ;;  %s474_s2 = inlined_call_operand.vmem [shape: f32[1,32], index: 2, kind: input, shape index: {}]   ;;  %s475_s3 = inlined_call_operand.vmem [shape: f32[1,32], index: 3, kind: input, shape index: {}]   ;;  %s476_s4 = inlined_call_operand.<no memory space> [shape: f32[1,1], index: 4, kind: input, shape index: {}]   ;;  %s477_s5 = inlined_call_operand.vmem [shape: f32[1,8], index: 5, kind: input, shape index: {}]   ;;  %s478_s7 = inlined_call_operand.vmem [shape: f32[2,1], index: 7, kind: output, shape index: {}]   ;;  %s479_s6 = inlined_call_operand.<no memory space> [shape: f32[1,1], index: 6, kind: input, shape index: {}]  }
   0x1   :  { %v12_v0 = vstv %s476_s4  ;;  %v14_v1 = vstv %s479_s6 }
   0x2   :  { %13 = vst [vmem:[#allocation2] sm:$0x1] %v12_v0  ;;  %15 = vst [vmem:[#allocation3] sm:$0x1] %v14_v1 }
   0x3   :  { %16 = vsyncpa [#allocation5], 0 }
   0x4   :  { %17 = vsyncpa [#allocation7], 0  ;;  %s379_s28 = smov [#allocation4]   ;;  %s331_s9 = scalar_lea.hbm %s472_s0, 256 }
   0x5   :  { %s23_s29 = sshll.u32 %s379_s28, 4  ;;  %p332_p0 = scmp.ne.s32.totalorder %s472_s0, %s331_s9  ;;  %s24_s29 = int_to_ptr.vmem [resolvable:$true] %s23_s29 }
   0x6   :  { %p335_p1 = scmp.lt.u32.totalorder %s331_s9, %s472_s0 }
   0x8   :  { %p337_p2 = pnand %p335_p1, %p332_p0 }
   0xa   :  { %340 = shalt.err (!%p337_p2)
}
   0xb   :  { %s341_s6 = scalar_lea.vmem %s24_s29, 256  ;;  %p346_p4 = scmp.lt.s32.totalorder %s24_s29, %s24_s29 }
   0xc   :  { %p342_p3 = scmp.ne.s32.totalorder %s24_s29, %s341_s6  ;;  %p347_p5 = scmp.lt.s32.totalorder %s341_s6, %s341_s6 }
   0xe   :  { %p348_p6 = por %p347_p5, %p346_p4 }
  0x10   :  { %p349_p7 = pnand %p348_p6, %p342_p3 }
  0x12   :  { %352 = shalt.err (!%p349_p7)
}
  0x13   :  { %s380_s13 = smov 128   ;;  %s381_s14 = smov 8  }
  0x14   :  { %29 = dma.hbm_to_vmem [thread:$0]  %s472_s0, 256, %s24_s29, [#allocation5], %s380_s13, %s380_s13, %s381_s14  }
  0x15   :  { %s382_s17 = smov [#allocation6]   ;;  %s353_s21 = scalar_lea.hbm %s473_s1, 512 }
  0x16   :  { %s35_s18 = sshll.u32 %s382_s17, 4  ;;  %p354_p8 = scmp.ne.s32.totalorder %s473_s1, %s353_s21  ;;  %s36_s18 = int_to_ptr.vmem [resolvable:$true] %s35_s18 }
  0x17   :  { %p357_p9 = scmp.lt.u32.totalorder %s353_s21, %s473_s1 }
  0x19   :  { %p359_p10 = pnand %p357_p9, %p354_p8 }
  0x1b   :  { %362 = shalt.err (!%p359_p10)
}
  0x1c   :  { %s363_s26 = scalar_lea.vmem %s36_s18, 512  ;;  %p368_p12 = scmp.lt.s32.totalorder %s36_s18, %s36_s18 }
  0x1d   :  { %p364_p11 = scmp.ne.s32.totalorder %s36_s18, %s363_s26  ;;  %p369_p13 = scmp.lt.s32.totalorder %s363_s26, %s363_s26 }
  0x1f   :  { %p370_p0 = por %p369_p13, %p368_p12 }
  0x21   :  { %p371_p1 = pnand %p370_p0, %p364_p11 }
  0x23   :  { %374 = shalt.err (!%p371_p1)
}
  0x24   :  { %41 = dma.hbm_to_vmem [thread:$0]  %s473_s1, 512, %s36_s18, [#allocation7], %s380_s13, %s380_s13, %s381_s14  }
  0x25   :  { %375 = dma.done.wait [#allocation5], 256  }
  0x26   :  { %376 = vsyncadd [#allocation5], 4294967040 }
  0x27   :  { %377 = dma.done.wait [#allocation7], 512  }
  0x28   :  { %378 = vsyncadd [#allocation7], 4294966784  ;;  %vm71_vm0 = vcmask 261120   ;;  %v60_v2 = vld [vmem:[#allocation6] sm:$0xff]  ;;  %v61_v3 = vld [vmem:[#allocation6 + $0x8] sm:$0xff]  ;;  %v383_v11 = vmov 0   ;;  %v232_v51 = vlaneseq }
  0x29   :  { %vm301_vm1 = vmpackc.low %vm71_vm0, %vm71_vm0  ;;  %v62_v4 = vld [vmem:[#allocation6 + $0x10] sm:$0xff]  ;;  %v300_v5 = vpack.c.bf16 %v61_v3, %v60_v2  ;;  %v63_v6 = vld [vmem:[#allocation6 + $0x18] sm:$0xff]  ;;  %317 = vset.pattern.permute.xlu1 %v383_v11  ;;  %318 = vset.pattern.permute.xlu0 %v383_v11  ;;  %vm242_vm2 = vcmask 1041409   ;;  %vm245_vm3 = vcmask 58368   ;;  %vm263_vm4 = vcmask 1024  }
  0x2a   :  { %v58_v7 = vld [vmem:[#allocation4] sm:$0xff]  ;;  %v306_v8 = vpack.c.bf16 %v63_v6, %v62_v4  ;;  %v59_v9 = vld [vmem:[#allocation4 + $0x8] sm:$0xff]  ;;  %v279_v10 = vld [vmem:[#allocation2] ss:$0 sm:$0xff]  ;;  %v233_v52 = vand.u32 127, %v232_v51  ;;  %v235_v53 = vshrl.u32 %v232_v51, 7 }
  0x2b   :  { %297 = vmatprep.mubr.msk.f32.mxu0 %vm71_vm0, %v58_v7  ;;  %302 = vmatprep.subr.msk.bf16.mxu0 %vm301_vm1, %v300_v5  ;;  %v280_v12 = vld [vmem:[%s477_s5] ss:$0 sm:$0xff]  ;;  %v281_v61 = vld [vmem:[#allocation3] ss:$0 sm:$0xff] }
  0x2c   :  { %305 = vmatpush3.bf16.xpose.msk.msra.mxu0 %vm301_vm1, %v300_v5  ;;  %197 = vperm.xlu1 %317, %v279_v10   ;;  %v271_v13 = vld [vmem:[%s474_s2] ss:$0 sm:$0xff]  ;;  %v236_v54 = vsub.s32 %v233_v52, %v235_v53 }
  0x2d   :  { %308 = vmatprep.subr.msk.bf16.mxu0 %vm301_vm1, %v306_v8  ;;  %v278_v26 = vld [vmem:[%s475_s3] ss:$0 sm:$0xff] }
  0x30   :  { %219 = vbcast.lane.b32.xlu1 %v280_v12, 256 }
  0x34   :  { %311 = vmatpush3.bf16.xpose.msk.msra.mxu0 %vm301_vm1, %v306_v8 }
  0x3b   :  { %298 = vmatmul.mubr.msk.f32.vlgmr.msra.gmra.mrb[0].mxu0 %vm71_vm0, %v59_v9 }
  0xab   :  { %v198_v33 = vpop.permute.xlu1 %197 }
  0xaf   :  { %v220_v43 = vpop.permute.xlu1 %219 }
 0x10e   :  { %v299_v14 = vpop.f32.mrb[0].mxu0 }
 0x10f   :  { %v162_v15 = vadd.f32 %v299_v14, %v271_v13  ;;  %v156_v16 = vpop.f32.mrb[1].mxu0 }
 0x110   :  { %v157_v17 = vadd.f32 %v271_v13, %v156_v16 }
 0x111   :  { %v168_v18 = vmul.f32 0.70710677, %v162_v15  ;;  %v166_v23 = vmul.f32 0.5, %v162_v15 }
 0x112   :  { %v167_v19 = vmul.f32 0.70710677, %v157_v17  ;;  %v165_v24 = vmul.f32 0.5, %v157_v17 }
 0x113   :  { %319 = verf.f32 %v168_v18 }
 0x114   :  { %321 = verf.f32 %v167_v19 }
 0x11d   :  { %v320_v20 = vpop.eup %319 }
 0x11e   :  { %v322_v21 = vpop.eup %321  ;;  %v172_v22 = vadd.f32 1.0, %v320_v20 }
 0x11f   :  { %v171_v25 = vadd.f32 1.0, %v322_v21 }
 0x120   :  { %v174_v28 = vmul.f32 %v172_v22, %v166_v23 }
 0x121   :  { %v173_v27 = vmul.f32 %v171_v25, %v165_v24 }
 0x122   :  { %v183_v31 = vmul.f32 %v278_v26, %v174_v28 }
 0x123   :  { %v182_v29 = vmul.f32 %v278_v26, %v173_v27 }
 0x124   :  { %v187_v32 = vsel %vm71_vm0, %v183_v31, 0.0 }
 0x125   :  { %v184_v30 = vsel %vm71_vm0, %v182_v29, 0.0 }
 0x126   :  { %185 = vadd.xlane.f32.xlu0 %v184_v30 }
 0x12a   :  { %188 = vadd.xlane.f32.xlu0 %v187_v32 }
 0x1b3   :  { %v186_v34 = vpop.xlane.xlu0 %185 }
 0x1b4   :  { %v200_v35 = vadd.f32 %v198_v33, %v186_v34 }
 0x1b6   :  { %v204_v36 = vmul.f32 0.70710677, %v200_v35  ;;  %v202_v41 = vmul.f32 0.5, %v200_v35 }
 0x1b7   :  { %v189_v37 = vpop.xlane.xlu0 %188 }
 0x1b8   :  { %323 = verf.f32 %v204_v36  ;;  %v201_v38 = vadd.f32 %v198_v33, %v189_v37 }
 0x1ba   :  { %v205_v39 = vmul.f32 0.70710677, %v201_v38  ;;  %v203_v46 = vmul.f32 0.5, %v201_v38 }
 0x1bc   :  { %325 = verf.f32 %v205_v39 }
 0x1c2   :  { %v324_v40 = vpop.eup %323 }
 0x1c3   :  { %v208_v42 = vadd.f32 1.0, %v324_v40 }
 0x1c5   :  { %v210_v44 = vmul.f32 %v208_v42, %v202_v41 }
 0x1c6   :  { %v326_v45 = vpop.eup %325 }
 0x1c7   :  { %v209_v47 = vadd.f32 1.0, %v326_v45  ;;  %v222_v48 = vmul.f32 %v220_v43, %v210_v44 }
 0x1c9   :  { %v211_v49 = vmul.f32 %v209_v47, %v203_v46  ;;  %227 = vperm.xlu0 %318, %v222_v48  }
 0x1cb   :  { %v223_v50 = vmul.f32 %v220_v43, %v211_v49 }
 0x1cd   :  { %230 = vperm.xlu1 %317, %v223_v50  }
 0x248   :  { %v228_v55 = vpop.permute.xlu0 %227 }
 0x249   :  { %v237_v57 = vrot.slane %v228_v55, %v236_v54 }
 0x24c   :  { %v231_v56 = vpop.permute.xlu1 %230 }
 0x24d   :  { %v241_v58 = vrot.slane %v231_v56, %v236_v54 }
 0x24f   :  { %v243_v59 = vsel %vm242_vm2, %v241_v58, %v237_v57 }
 0x250   :  { %v246_v60 = vsel %vm245_vm3, %v243_v59, 0.0 }
 0x251   :  { %247 = vadd.xlane.f32.xlu1 %v246_v60 }
 0x2de   :  { %v248_v62 = vpop.xlane.xlu1 %247 }
 0x2df   :  { %v256_v63 = vadd.f32 %v281_v61, %v248_v62 }
 0x2e1   :  { %v282_v0 = vmul.f32 -1.442695, %v256_v63 }
 0x2e3   :  { %327 = vpow2.f32 %v282_v0 }
 0x2ed   :  { %v328_v1 = vpop.eup %327 }
 0x2ee   :  { %v260_v2 = vadd.f32 1.0, %v328_v1 }
 0x2f0   :  { %329 = vrcp.f32 %v260_v2 }
 0x2fa   :  { %v330_v3 = vpop.eup %329 }
 0x2fb   :  { %264 = vst.msk [vmem:[%s478_s7] sm:$0x3] %vm263_vm4, %v330_v3 }
 0x2fc   :  { %269 = vsyncpa [#allocation5], 1 }
 0x2fd   :  { %270 = vsyncpa [#allocation7], 1 }

</bundles_post_ra>
